<compile_context>
chip_gen: v7x
topology: tpu7x:2x2x1
jax: 0.10.0
libtpu: 0.0.40
codegen_flags: <defaults>
</compile_context>

<pallas_src>
import functools

import jax
import jax.numpy as jnp
from jax.experimental import pallas as pl
from jax.experimental.pallas import tpu as pltpu


def _round_up(x, m):
    return ((x + m - 1) // m) * m


def mlp_kernel(x_ref,
               w_in_ref, b_in_ref,
               w0_ref, b0_ref,
               w1_ref, b1_ref,
               w_out_ref, b_out_ref,
               o_ref):
    """Fused forward pass for one batch tile.

    x_ref:     (TB, D_in)  f32   (cast to bf16 in-kernel)
    w_in_ref:  (D_in, U)   bf16,  b_in_ref:  (1, U)    f32
    w0_ref:    (U, U)      bf16,  b0_ref:    (1, U)    f32
    w1_ref:    (U, U)      bf16,  b1_ref:    (1, U)    f32
    w_out_ref: (U, OUTp)   bf16,  b_out_ref: (1, OUTp) f32
    o_ref:     (TB, OUTp)  bf16
    """
    # cast rides the free VPU slots under the MXU work
    x = x_ref[...].astype(jnp.bfloat16)

    # input layer: relu(dropout(Linear(x)))  [dropout == identity at eval]
    y = jnp.dot(x, w_in_ref[...], preferred_element_type=jnp.float32)
    y = jnp.maximum(y + b_in_ref[...], 0.0).astype(jnp.bfloat16)

    # hidden layer 0
    y = jnp.dot(y, w0_ref[...], preferred_element_type=jnp.float32)
    y = jnp.maximum(y + b0_ref[...], 0.0).astype(jnp.bfloat16)

    # hidden layer 1
    y = jnp.dot(y, w1_ref[...], preferred_element_type=jnp.float32)
    y = jnp.maximum(y + b1_ref[...], 0.0).astype(jnp.bfloat16)

    # output layer (no activation), bf16 store (lane-dense 128-wide)
    out = jnp.dot(y, w_out_ref[...], preferred_element_type=jnp.float32)
    o_ref[...] = (out + b_out_ref[...]).astype(o_ref.dtype)


def pack_params(params):
    """One-time packing: bf16 weights, f32 biases, output features padded 102 -> 128.

    Done outside the jitted forward so per-call HLO has no convert/pad ops.
    """
    bf16 = jnp.bfloat16
    U = params["w_in"].shape[1]
    OUT = params["w_out"].shape[1]
    OUTp = _round_up(OUT, 128)
    return dict(
        w_in=params["w_in"].astype(bf16),                       # (D_in, U), no K-pad
        b_in=params["b_in"].astype(jnp.float32),
        w0=params["w0"].astype(bf16),
        b0=params["b0"].astype(jnp.float32),
        w1=params["w1"].astype(bf16),
        b1=params["b1"].astype(jnp.float32),
        w_out=jnp.zeros((U, OUTp), bf16).at[:, :OUT].set(params["w_out"].astype(bf16)),
        b_out=jnp.zeros((1, OUTp), jnp.float32).at[:, :OUT].set(
            params["b_out"].astype(jnp.float32)),
    )


@functools.partial(jax.jit, static_argnames=("n_out", "tb"))
def deep_ffn_forward(x, packed, *, n_out=102, tb=None):
    """x: (B, D_in) float32. packed: output of pack_params().

    Returns (B, n_out) float32 logits.
    """
    B, D_in = x.shape
    U = packed["w_in"].shape[1]
    OUTp = packed["w_out"].shape[1]

    if tb is None:
        # Large tiles amortize the ~0.35us per-grid-step overhead; cap so the
        # double-buffered f32 x tile stays ~4 MiB (safe for v5e 16 MiB / v7x 32 MiB
        # scoped VMEM), and for B > 512 keep >= 2 grid steps so v7x's two
        # TensorCores both get work via the "parallel" batch axis.
        tb_cap = max(256, min(1024, ((4 << 20) // (4 * D_in)) // 8 * 8))
        if B <= 512:
            tb = min(_round_up(B, 8), tb_cap)
        else:
            tb = min(_round_up((B + 1) // 2, 8), tb_cap)

    Bp = _round_up(B, tb)
    # Pad batch only when needed (shapes are static under jit, so this branch is
    # resolved at trace time; the common large-B multiple-of-tile case copies nothing).
    xp = x if Bp == B else jnp.zeros((Bp, D_in), x.dtype).at[:B, :].set(x)

    grid = (Bp // tb,)

    # constant index maps -> weights/biases stay VMEM-resident across grid steps
    full = lambda r, c: pl.BlockSpec((r, c), lambda i: (0, 0))

    flops = 2 * Bp * (D_in * U + 2 * U * U + U * OUTp)
    bytes_accessed = (
        Bp * D_in * 4                                                # x (f32 read)
        + (packed["w_in"].size + packed["w0"].size
           + packed["w1"].size + packed["w_out"].size) * 2           # bf16 weights
        + (packed["b_in"].size + packed["b0"].size
           + packed["b1"].size + packed["b_out"].size) * 4           # f32 biases
        + Bp * OUTp * 2)                                             # bf16 output

    out = pl.pallas_call(
        mlp_kernel,
        out_shape=jax.ShapeDtypeStruct((Bp, OUTp), jnp.bfloat16),
        grid_spec=pl.GridSpec(
            grid=grid,
            in_specs=[
                pl.BlockSpec((tb, D_in), lambda i: (i, 0)),   # x: tiled over batch
                full(D_in, U), full(1, U),                    # input layer
                full(U, U), full(1, U),                       # hidden layer 0
                full(U, U), full(1, U),                       # hidden layer 1
                full(U, OUTp), full(1, OUTp),                 # output layer (padded)
            ],
            out_specs=pl.BlockSpec((tb, OUTp), lambda i: (i, 0)),
        ),
        compiler_params=pltpu.CompilerParams(
            dimension_semantics=("parallel",)),
        cost_estimate=pl.CostEstimate(
            flops=flops, transcendentals=0, bytes_accessed=bytes_accessed),
    )(xp,
      packed["w_in"], packed["b_in"],
      packed["w0"], packed["b0"],
      packed["w1"], packed["b1"],
      packed["w_out"], packed["b_out"])

    return out[:B, :n_out].astype(jnp.float32)


def init_params(key, input_shape, units=128, n_classes=102):
    """Deterministic synthetic init (uniform, same ranges as PyTorch default).

    Weights stored as (in_features, out_features), i.e. transpose of nn.Linear.weight,
    so y = x @ W + b == F.linear(x, W_pt, b).
    """
    def linear(k, fan_in, fan_out):
        k1, k2 = jax.random.split(k)
        bound = 1.0 / (fan_in ** 0.5)
        w = jax.random.uniform(k1, (fan_in, fan_out), jnp.float32, -bound, bound)
        b = jax.random.uniform(k2, (1, fan_out), jnp.float32, -bound, bound)
        return w, b

    keys = jax.random.split(key, 4)
    w_in, b_in = linear(keys[0], input_shape, units)
    w0, b0 = linear(keys[1], units, units)
    w1, b1 = linear(keys[2], units, units)
    w_out, b_out = linear(keys[3], units, n_classes)
    return dict(w_in=w_in, b_in=b_in, w0=w0, b0=b0,
                w1=w1, b1=b1, w_out=w_out, b_out=b_out)


def reference_forward_f32(x, p):
    relu = lambda t: jnp.maximum(t, 0.0)
    y = relu(x @ p["w_in"] + p["b_in"])
    y = relu(y @ p["w0"] + p["b0"])
    y = relu(y @ p["w1"] + p["b1"])
    return y @ p["w_out"] + p["b_out"]


def reference_forward_bf16(x, p):
    """Same math as the kernel: bf16 operands, f32 accumulation, bf16 final store."""
    bf = jnp.bfloat16

    def lin(a, w, b):
        return jnp.dot(a.astype(bf), w.astype(bf),
                       preferred_element_type=jnp.float32) + b

    y = jnp.maximum(lin(x, p["w_in"], p["b_in"]), 0.0)
    y = jnp.maximum(lin(y, p["w0"], p["b0"]), 0.0)
    y = jnp.maximum(lin(y, p["w1"], p["b1"]), 0.0)
    return lin(y, p["w_out"], p["b_out"]).astype(bf).astype(jnp.float32)


if __name__ == "__main__":
    key = jax.random.PRNGKey(0)
    k_x, k_p = jax.random.split(key)

    # small test shapes; batch=20 (not a tile multiple) exercises batch padding,
    # the in-kernel f32->bf16 cast, and the 102->128 lane-padded bf16 output path.
    batch, input_shape, units, n_classes = 20, 64, 128, 102
    x = jax.random.normal(k_x, (batch, input_shape), jnp.float32)
    params = init_params(k_p, input_shape, units=units, n_classes=n_classes)
    packed = pack_params(params)

    # explicit small tile -> multi-step grid (Bp=32, 2 steps)
    out = deep_ffn_forward(x, packed, n_out=n_classes, tb=16)
    out = jax.block_until_ready(out)
    assert out.shape == (batch, n_classes), out.shape

    # exact-semantics reference (bf16 operands, f32 accumulate, bf16 store)
    ref_bf16 = reference_forward_bf16(x, params)
    assert jnp.allclose(out, ref_bf16, atol=2e-2, rtol=2e-2), \
        float(jnp.max(jnp.abs(out - ref_bf16)))

    # sanity check against full-f32 reference (loose tolerance for bf16 matmuls)
    ref_f32 = reference_forward_f32(x, params)
    assert jnp.allclose(out, ref_f32, atol=1e-1, rtol=1e-1), \
        float(jnp.max(jnp.abs(out - ref_f32)))

    # also run with the default (auto) tile selection
    out2 = jax.block_until_ready(deep_ffn_forward(x, packed, n_out=n_classes))
    assert out2.shape == (batch, n_classes), out2.shape
    assert jnp.allclose(out2, ref_bf16, atol=2e-2, rtol=2e-2)

    print("KERNEL_OK")
</pallas_src>

<mosaic_0001>
module attributes {stable_mosaic.version = 11 : i64} {
  func.func @mlp_kernel(%arg0: i32, %arg1: memref<16x64xf32, #tpu.memory_space<vmem>>, %arg2: memref<64x128xbf16, #tpu.memory_space<vmem>>, %arg3: memref<1x128xf32, #tpu.memory_space<vmem>>, %arg4: memref<128x128xbf16, #tpu.memory_space<vmem>>, %arg5: memref<1x128xf32, #tpu.memory_space<vmem>>, %arg6: memref<128x128xbf16, #tpu.memory_space<vmem>>, %arg7: memref<1x128xf32, #tpu.memory_space<vmem>>, %arg8: memref<128x128xbf16, #tpu.memory_space<vmem>>, %arg9: memref<1x128xf32, #tpu.memory_space<vmem>>, %arg10: memref<16x128xbf16, #tpu.memory_space<vmem>>) attributes {dimension_semantics = [#tpu.dimension_semantics<parallel>], iteration_bounds = array<i64: 2>, scalar_prefetch = 0 : i64, scratch_operands = 0 : i64, tpu.core_type = #tpu.core_type<tc>, window_params = [{transform_indices = @transform_0, window_bounds = array<i64: 16, 64>}, {pipeline_mode = #tpu.pipeline_mode<synchronous>, transform_indices = @transform_1, window_bounds = array<i64: 64, 128>}, {pipeline_mode = #tpu.pipeline_mode<synchronous>, transform_indices = @transform_2, window_bounds = array<i64: 1, 128>}, {pipeline_mode = #tpu.pipeline_mode<synchronous>, transform_indices = @transform_3, window_bounds = array<i64: 128, 128>}, {pipeline_mode = #tpu.pipeline_mode<synchronous>, transform_indices = @transform_4, window_bounds = array<i64: 1, 128>}, {pipeline_mode = #tpu.pipeline_mode<synchronous>, transform_indices = @transform_5, window_bounds = array<i64: 128, 128>}, {pipeline_mode = #tpu.pipeline_mode<synchronous>, transform_indices = @transform_6, window_bounds = array<i64: 1, 128>}, {pipeline_mode = #tpu.pipeline_mode<synchronous>, transform_indices = @transform_7, window_bounds = array<i64: 128, 128>}, {pipeline_mode = #tpu.pipeline_mode<synchronous>, transform_indices = @transform_8, window_bounds = array<i64: 1, 128>}, {transform_indices = @transform_9, window_bounds = array<i64: 16, 128>}]} {
    %c0 = arith.constant 0 : index
    %c0_0 = arith.constant 0 : index
    %0 = vector.load %arg1[%c0, %c0_0] : memref<16x64xf32, #tpu.memory_space<vmem>>, vector<16x64xf32>
    %1 = arith.truncf %0 : vector<16x64xf32> to vector<16x64xbf16>
    %c0_1 = arith.constant 0 : index
    %c0_2 = arith.constant 0 : index
    %2 = vector.load %arg2[%c0_1, %c0_2] : memref<64x128xbf16, #tpu.memory_space<vmem>>, vector<64x128xbf16>
    %cst = arith.constant dense<0.000000e+00> : vector<16x128xf32>
    %3 = tpu.matmul %1, %2, %cst {dimension_numbers = #tpu.dot_dimension_numbers<[1], [0], [0], [1], [0, 0, 1, 1], [], []>} : vector<16x64xbf16>, vector<64x128xbf16>, vector<16x128xf32> -> vector<16x128xf32>
    %c0_3 = arith.constant 0 : index
    %c0_4 = arith.constant 0 : index
    %4 = vector.load %arg3[%c0_3, %c0_4] : memref<1x128xf32, #tpu.memory_space<vmem>>, vector<1x128xf32>
    %5 = vector.broadcast %4 : vector<1x128xf32> to vector<16x128xf32>
    %6 = arith.addf %3, %5 : vector<16x128xf32>
    %cst_5 = arith.constant 0.000000e+00 : f32
    %7 = vector.broadcast %cst_5 : f32 to vector<16x128xf32>
    %8 = arith.maximumf %6, %7 : vector<16x128xf32>
    %9 = arith.truncf %8 : vector<16x128xf32> to vector<16x128xbf16>
    %c0_6 = arith.constant 0 : index
    %c0_7 = arith.constant 0 : index
    %10 = vector.load %arg4[%c0_6, %c0_7] : memref<128x128xbf16, #tpu.memory_space<vmem>>, vector<128x128xbf16>
    %cst_8 = arith.constant dense<0.000000e+00> : vector<16x128xf32>
    %11 = tpu.matmul %9, %10, %cst_8 {dimension_numbers = #tpu.dot_dimension_numbers<[1], [0], [0], [1], [0, 0, 1, 1], [], []>} : vector<16x128xbf16>, vector<128x128xbf16>, vector<16x128xf32> -> vector<16x128xf32>
    %c0_9 = arith.constant 0 : index
    %c0_10 = arith.constant 0 : index
    %12 = vector.load %arg5[%c0_9, %c0_10] : memref<1x128xf32, #tpu.memory_space<vmem>>, vector<1x128xf32>
    %13 = vector.broadcast %12 : vector<1x128xf32> to vector<16x128xf32>
    %14 = arith.addf %11, %13 : vector<16x128xf32>
    %cst_11 = arith.constant 0.000000e+00 : f32
    %15 = vector.broadcast %cst_11 : f32 to vector<16x128xf32>
    %16 = arith.maximumf %14, %15 : vector<16x128xf32>
    %17 = arith.truncf %16 : vector<16x128xf32> to vector<16x128xbf16>
    %c0_12 = arith.constant 0 : index
    %c0_13 = arith.constant 0 : index
    %18 = vector.load %arg6[%c0_12, %c0_13] : memref<128x128xbf16, #tpu.memory_space<vmem>>, vector<128x128xbf16>
    %cst_14 = arith.constant dense<0.000000e+00> : vector<16x128xf32>
    %19 = tpu.matmul %17, %18, %cst_14 {dimension_numbers = #tpu.dot_dimension_numbers<[1], [0], [0], [1], [0, 0, 1, 1], [], []>} : vector<16x128xbf16>, vector<128x128xbf16>, vector<16x128xf32> -> vector<16x128xf32>
    %c0_15 = arith.constant 0 : index
    %c0_16 = arith.constant 0 : index
    %20 = vector.load %arg7[%c0_15, %c0_16] : memref<1x128xf32, #tpu.memory_space<vmem>>, vector<1x128xf32>
    %21 = vector.broadcast %20 : vector<1x128xf32> to vector<16x128xf32>
    %22 = arith.addf %19, %21 : vector<16x128xf32>
    %cst_17 = arith.constant 0.000000e+00 : f32
    %23 = vector.broadcast %cst_17 : f32 to vector<16x128xf32>
    %24 = arith.maximumf %22, %23 : vector<16x128xf32>
    %25 = arith.truncf %24 : vector<16x128xf32> to vector<16x128xbf16>
    %c0_18 = arith.constant 0 : index
    %c0_19 = arith.constant 0 : index
    %26 = vector.load %arg8[%c0_18, %c0_19] : memref<128x128xbf16, #tpu.memory_space<vmem>>, vector<128x128xbf16>
    %cst_20 = arith.constant dense<0.000000e+00> : vector<16x128xf32>
    %27 = tpu.matmul %25, %26, %cst_20 {dimension_numbers = #tpu.dot_dimension_numbers<[1], [0], [0], [1], [0, 0, 1, 1], [], []>} : vector<16x128xbf16>, vector<128x128xbf16>, vector<16x128xf32> -> vector<16x128xf32>
    %c0_21 = arith.constant 0 : index
    %c0_22 = arith.constant 0 : index
    %28 = vector.load %arg9[%c0_21, %c0_22] : memref<1x128xf32, #tpu.memory_space<vmem>>, vector<1x128xf32>
    %29 = vector.broadcast %28 : vector<1x128xf32> to vector<16x128xf32>
    %30 = arith.addf %27, %29 : vector<16x128xf32>
    %31 = arith.truncf %30 : vector<16x128xf32> to vector<16x128xbf16>
    %c0_23 = arith.constant 0 : index
    %c0_24 = arith.constant 0 : index
    %32 = vector.load %arg10[%c0_23, %c0_24] : memref<16x128xbf16, #tpu.memory_space<vmem>>, vector<16x128xbf16>
    tpu.vector_store %arg10[%c0_23, %c0_24], %31 {strides = array<i32>} : memref<16x128xbf16, #tpu.memory_space<vmem>>, vector<16x128xbf16>,
    return
  }
  func.func @transform_0(%arg0: i32) -> (i32, i32) {
    %c0_i32 = arith.constant 0 : i32
    %c0_i32_0 = arith.constant 0 : i32
    return %arg0, %c0_i32 : i32, i32
  }
  func.func @transform_1(%arg0: i32) -> (i32, i32) {
    %c0_i32 = arith.constant 0 : i32
    %c0_i32_0 = arith.constant 0 : i32
    %c0_i32_1 = arith.constant 0 : i32
    return %c0_i32, %c0_i32_0 : i32, i32
  }
  func.func @transform_2(%arg0: i32) -> (i32, i32) {
    %c0_i32 = arith.constant 0 : i32
    %c0_i32_0 = arith.constant 0 : i32
    %c0_i32_1 = arith.constant 0 : i32
    return %c0_i32, %c0_i32_0 : i32, i32
  }
  func.func @transform_3(%arg0: i32) -> (i32, i32) {
    %c0_i32 = arith.constant 0 : i32
    %c0_i32_0 = arith.constant 0 : i32
    %c0_i32_1 = arith.constant 0 : i32
    return %c0_i32, %c0_i32_0 : i32, i32
  }
  func.func @transform_4(%arg0: i32) -> (i32, i32) {
    %c0_i32 = arith.constant 0 : i32
    %c0_i32_0 = arith.constant 0 : i32
    %c0_i32_1 = arith.constant 0 : i32
    return %c0_i32, %c0_i32_0 : i32, i32
  }
  func.func @transform_5(%arg0: i32) -> (i32, i32) {
    %c0_i32 = arith.constant 0 : i32
    %c0_i32_0 = arith.constant 0 : i32
    %c0_i32_1 = arith.constant 0 : i32
    return %c0_i32, %c0_i32_0 : i32, i32
  }
  func.func @transform_6(%arg0: i32) -> (i32, i32) {
    %c0_i32 = arith.constant 0 : i32
    %c0_i32_0 = arith.constant 0 : i32
    %c0_i32_1 = arith.constant 0 : i32
    return %c0_i32, %c0_i32_0 : i32, i32
  }
  func.func @transform_7(%arg0: i32) -> (i32, i32) {
    %c0_i32 = arith.constant 0 : i32
    %c0_i32_0 = arith.constant 0 : i32
    %c0_i32_1 = arith.constant 0 : i32
    return %c0_i32, %c0_i32_0 : i32, i32
  }
  func.func @transform_8(%arg0: i32) -> (i32, i32) {
    %c0_i32 = arith.constant 0 : i32
    %c0_i32_0 = arith.constant 0 : i32
    %c0_i32_1 = arith.constant 0 : i32
    return %c0_i32, %c0_i32_0 : i32, i32
  }
  func.func @transform_9(%arg0: i32) -> (i32, i32) {
    %c0_i32 = arith.constant 0 : i32
    %c0_i32_0 = arith.constant 0 : i32
    return %arg0, %c0_i32 : i32, i32
  }
}

</mosaic_0001>

<bundles_post_ra>
// kernel: deep_ffn_forward.1
= control target key start
LH: loop header
LB: loop body
LE: loop exit
PB: predicated region body
PF: predicated region fallthrough
CT: control target
= control target key end

     0   :  { %14 = vsyncpa [#allocation3], 0  ;;  %s1507_s0 = inlined_call_operand.vmem [shape: f32[32,64], index: 0, kind: input, shape index: {}]   ;;  %s1508_s1 = inlined_call_operand.hbm [shape: bf16[64,128], index: 1, kind: input, shape index: {}]   ;;  %s1509_s2 = inlined_call_operand.vmem [shape: f32[1,128], index: 2, kind: input, shape index: {}]   ;;  %s1510_s3 = inlined_call_operand.vmem [shape: bf16[128,128], index: 3, kind: input, shape index: {}]   ;;  %s1511_s4 = inlined_call_operand.vmem [shape: f32[1,128], index: 4, kind: input, shape index: {}]   ;;  %s1512_s5 = inlined_call_operand.hbm [shape: bf16[128,128], index: 5, kind: input, shape index: {}]   ;;  %s1513_s6 = inlined_call_operand.vmem [shape: f32[1,128], index: 6, kind: input, shape index: {}]   ;;  %s1514_s7 = inlined_call_operand.hbm [shape: bf16[128,128], index: 7, kind: input, shape index: {}]   ;;  %s1515_s8 = inlined_call_operand.vmem [shape: f32[1,128], index: 8, kind: input, shape index: {}]   ;;  %s1516_s9 = inlined_call_operand.vmem [shape: bf16[32,128], index: 9, kind: output, shape index: {}]  }
   0x1   :  { %15 = vsyncpa [#allocation5], 0  ;;  %s1301_s30 = smov 0  }
   0x2 LB: > { %s910_s10 = sadd.s32 4294967295, %s1242_s30   ;;  %p912_p0 = scmp.ge.s32.totalorder %s1242_s30, 1  ;;  %s1242_s30 = sphi %s1301_s30, %s21_s30  }
   0x3   : > { %p246_p1 = scmp.lt.s32.totalorder %s1242_s30, 3  ;;  %p1311_p2 = scmp.eq.s32.totalorder %s910_s10, 0 }
   0x4   : > { %s1244_s13 = smov [#allocation4]   ;;  %s1245_s15 = smov [#allocation2]  }
   0x5   : > { %s1520_s11 = scalar_select %p1311_p2, 1, 0 }
   0x6   : > { %p1315_p3 = pnand %p912_p0, %p246_p1  ;;  %s280_s14 = sshll.u32 %s1244_s13, 4  ;;  %s281_s14 = int_to_ptr.vmem [resolvable:$true] %s280_s14 }
   0x7   : > { %s258_s16 = sshll.u32 %s1245_s15, 4  ;;  %s1246_s18 = smov [#allocation6]   ;;  %s1327_s16 = int_to_ptr.vmem [resolvable:$true] %s258_s16 }
   0x8   : > { %s1521_s12 = scalar_select %p1315_p3, 1, 0 }
   0x9   : > { %p1085_p4 = pneg %p1315_p3  ;;  %s296_s19 = sshll.u32 %s1246_s18, 4  ;;  %s1329_s19 = int_to_ptr.vmem [resolvable:$true] %s296_s19 }
   0xa   : > { %s1144_s22 = scalar_lea.hbm %s1512_s5, 1024 }
   0xb   : > { %p1323_p5 = pnand %p1311_p2, %p1085_p4  ;;  %p1145_p6 = scmp.ne.s32.totalorder %s1512_s5, %s1144_s22 }
   0xc   : > { %p1151_p10 = scmp.lt.u32.totalorder %s1144_s22, %s1512_s5 }
   0xd   : > { %p1339_p7 = pneg %p1323_p5 }
   0xf   : > { %p1147_p8 = pnand %p1339_p7, %p1145_p6 }
  0x11   : > { %p1148_p9 = pneg %p1147_p8 }
  0x13   : > { %p1153_p11 = pnand %p1151_p10, %p1148_p9 }
  0x15   : > { %1156 = shalt.err (!%p1153_p11)
}
  0x16   : > { %s1157_s28 = scalar_lea.vmem %s281_s14, 1024  ;;  %p1165_p1 = scmp.lt.s32.totalorder %s281_s14, %s281_s14 }
  0x17   : > { %p1158_p12 = scmp.ne.s32.totalorder %s281_s14, %s1157_s28  ;;  %p1166_p4 = scmp.lt.s32.totalorder %s1157_s28, %s1157_s28 }
  0x19   : > { %p1160_p13 = pnand %p1158_p12, %p1339_p7  ;;  %p1167_p2 = por %p1166_p4, %p1165_p1 }
  0x1b   : > { %p1161_p0 = pneg %p1160_p13 }
  0x1d   : > { %p1168_p3 = pnand %p1167_p2, %p1161_p0 }
  0x1f   : > { %1171 = shalt.err (!%p1168_p3)
}
  0x20   : > { %s1247_s29 = smov 64   ;;  %s1248_s13 = smov 4  }
  0x21   : > { %1091 = dma.hbm_to_vmem [thread:$0]  (!%p1323_p5), %s1512_s5, 1024, %s281_s14, [#allocation5], %s1247_s29, %s1247_s29, %s1248_s13  }
  0x22   : > { %s1172_s22 = scalar_lea.hbm %s1508_s1, 512 }
  0x23   : > { %p1173_p2 = scmp.ne.s32.totalorder %s1508_s1, %s1172_s22  ;;  %p1179_p8 = scmp.lt.u32.totalorder %s1172_s22, %s1508_s1 }
  0x25   : > { %p1175_p3 = pnand %p1173_p2, %p1339_p7 }
  0x27   : > { %p1176_p6 = pneg %p1175_p3 }
  0x29   : > { %p1181_p9 = pnand %p1179_p8, %p1176_p6 }
  0x2b   : > { %1184 = shalt.err (!%p1181_p9)
}
  0x2c   : > { %s1185_s14 = scalar_lea.vmem %s1327_s16, 512  ;;  %p1193_p13 = scmp.lt.s32.totalorder %s1327_s16, %s1327_s16 }
  0x2d   : > { %p1186_p10 = scmp.ne.s32.totalorder %s1327_s16, %s1185_s14  ;;  %p1194_p0 = scmp.lt.s32.totalorder %s1185_s14, %s1185_s14 }
  0x2f   : > { %p1188_p11 = pnand %p1186_p10, %p1339_p7  ;;  %p1195_p1 = por %p1194_p0, %p1193_p13 }
  0x31   : > { %p1189_p12 = pneg %p1188_p11 }
  0x33   : > { %p1196_p4 = pnand %p1195_p1, %p1189_p12 }
  0x35   : > { %1199 = shalt.err (!%p1196_p4)
}
  0x36   : > { %1088 = dma.hbm_to_vmem [thread:$0]  (!%p1323_p5), %s1508_s1, 512, %s1327_s16, [#allocation3], %s1247_s29, %s1247_s29, %s1248_s13  }
  0x37   : > { %s1200_s21 = scalar_lea.hbm %s1514_s7, 1024 }
  0x38   : > { %p1201_p2 = scmp.ne.s32.totalorder %s1514_s7, %s1200_s21  ;;  %p1207_p8 = scmp.lt.u32.totalorder %s1200_s21, %s1514_s7 }
  0x3a   : > { %p1203_p3 = pnand %p1201_p2, %p1339_p7 }
  0x3c   : > { %p1204_p6 = pneg %p1203_p3 }
  0x3e   : > { %p1209_p9 = pnand %p1207_p8, %p1204_p6 }
  0x40   : > { %1212 = shalt.err (!%p1209_p9)
}
  0x41   : > { %s1213_s16 = scalar_lea.vmem %s1329_s19, 1024  ;;  %p1221_p13 = scmp.lt.s32.totalorder %s1329_s19, %s1329_s19 }
  0x42   : > { %p1214_p10 = scmp.ne.s32.totalorder %s1329_s19, %s1213_s16  ;;  %p1222_p0 = scmp.lt.s32.totalorder %s1213_s16, %s1213_s16 }
  0x44   : > { %p1216_p11 = pnand %p1214_p10, %p1339_p7  ;;  %p1223_p1 = por %p1222_p0, %p1221_p13 }
  0x46   : > { %p1217_p12 = pneg %p1216_p11 }
  0x48   : > { %p1224_p4 = pnand %p1223_p1, %p1217_p12 }
  0x4a   : > { %1227 = shalt.err (!%p1224_p4)
}
  0x4b   : > { %1094 = dma.hbm_to_vmem [thread:$0]  (!%p1323_p5), %s1514_s7, 1024, %s1329_s19, [#allocation5], %s1247_s29, %s1247_s29, %s1248_s13  }
  0x4c   : > { %p1524_p2 = scmp.ne.s32.totalorder %s1521_s12, 0 }
  0x4d   : > { %p1525_p7 = scmp.ne.s32.totalorder (!%p1524_p2), %s1520_s11, 0 }
  0x4e   : > { %324 = sbr.rel (%p1524_p2) target bundleno = 985 (0x3d9), region = 56 }
  0x55   : > { %1233 = dma.done.wait (%p1525_p7), [#allocation3], 512  }
  0x56   : > { %1235 = vsyncadd (%p1525_p7), [#allocation3], 4294966784 }
  0x57   : > { %1237 = dma.done.wait (%p1525_p7), [#allocation5], 2048  }
  0x58   : > { %1239 = vsyncadd (%p1525_p7), [#allocation5], 4294965248  ;;  %s921_s17 = sshll.u32 %s910_s10, 1  ;;  %v1249_v0 = vmov 0.0   ;;  %vm1250_vm0 = vmmov 0   ;;  %v1116_v1 = vld [vmem:[#allocation2] sm:$0xff]  }
  0x59   : > { %1001 = vmatprep.subr.bf16.mxu0 %v1249_v0  ;;  %1009 = vmatprep.mubr.msk.bf16.mxu0 %vm1250_vm0, %v1249_v0  ;;  %p369_p5 = scmp.lt.s32.totalorder %s921_s17, 3  ;;  %v1117_v2 = vld [vmem:[#allocation2 + $0x8] sm:$0xff]   ;;  %v1120_v3 = vld [vmem:[%s1510_s3] sm:$0xff]   ;;  %v1118_v4 = vld [vmem:[#allocation2 + $0x10] sm:$0xff]   ;;  %vm423_vm1 = vcmask 523264  }
  0x5a   : > { %1013 = vmatprep.subr.bf16.mxu1 %v1249_v0  ;;  %1029 = vmatprep.mubr.msk.bf16.mxu1 %vm1250_vm0, %v1249_v0  ;;  %v1121_v5 = vld [vmem:[%s1510_s3 + $0x8] sm:$0xff]   ;;  %v1119_v6 = vld [vmem:[#allocation2 + $0x18] sm:$0xff]   ;;  %v1122_v9 = vld [vmem:[%s1510_s3 + $0x10] sm:$0xff]  }
  0x5b   : > { %s1527_s17 = smov (!%p369_p5, %s921_s17), 3  ;;  %1002 = vmatpush3.bf16.msra.mxu0 %v1116_v1  ;;  %1014 = vmatpush3.bf16.msra.mxu1 %v1120_v3  ;;  %v1123_v11 = vld [vmem:[%s1510_s3 + $0x18] sm:$0xff]   ;;  %v1124_v12 = vld [vmem:[%s1510_s3 + $0x20] sm:$0xff]   ;;  %v1125_v13 = vld [vmem:[%s1510_s3 + $0x28] sm:$0xff]  }
  0x5c   : > { %1003 = vmatprep.subr.bf16.mxu0 %v1249_v0  ;;  %s922_s10 = sshll.u32 %s1527_s17, 3  ;;  %1015 = vmatprep.subr.bf16.mxu1 %v1249_v0  ;;  %v1126_v14 = vld [vmem:[%s1510_s3 + $0x30] sm:$0xff]   ;;  %v1127_v15 = vld [vmem:[%s1510_s3 + $0x38] sm:$0xff]   ;;  %v1128_v16 = vld [vmem:[#allocation4] sm:$0xff]   ;;  %s924_s18 = sshll.u32 %s1527_s17, 2 }
  0x5d   : > { %s372_s29 = scalar_lea.vmem %s1507_s0, %s922_s10  ;;  %v1129_v17 = vld [vmem:[#allocation4 + $0x8] sm:$0xff]   ;;  %v1130_v18 = vld [vmem:[#allocation4 + $0x10] sm:$0xff]   ;;  %v1131_v19 = vld [vmem:[#allocation4 + $0x18] sm:$0xff]   ;;  %s378_s22 = scalar_lea.vmem %s1516_s9, %s924_s18 }
  0x5e   : > { %v381_v7 = vld [vmem:[%s372_s29] sm:$0xff]  ;;  %v382_v8 = vld [vmem:[%s372_s29 + $0x8] sm:$0xff]  ;;  %v1134_v32 = vld [vmem:[#allocation4 + $0x30] sm:$0xff]  }
  0x5f   : > { %1004 = vmatpush3.bf16.msra.mxu0 %v1117_v2  ;;  %1016 = vmatpush3.bf16.msra.mxu1 %v1121_v5  ;;  %v383_v10 = vpack.c.bf16 %v382_v8, %v381_v7  ;;  %v1132_v20 = vld [vmem:[#allocation4 + $0x20] sm:$0xff]   ;;  %v1133_v21 = vld [vmem:[#allocation4 + $0x28] sm:$0xff]   ;;  %v1135_v33 = vld [vmem:[#allocation4 + $0x38] sm:$0xff]  }
  0x60   : > { %1005 = vmatprep.subr.bf16.mxu0 %v1249_v0  ;;  %1017 = vmatprep.subr.bf16.mxu1 %v1249_v0  ;;  %v925_v22 = vld [vmem:[%s1509_s2] ss:$0 sm:$0xff]  ;;  %v1137_v35 = vld [vmem:[#allocation6 + $0x8] sm:$0xff]   ;;  %v1138_v36 = vld [vmem:[#allocation6 + $0x10] sm:$0xff]  }
  0x61   : > { %v1136_v34 = vld [vmem:[#allocation6] sm:$0xff]   ;;  %v1139_v37 = vld [vmem:[#allocation6 + $0x18] sm:$0xff]   ;;  %v1141_v39 = vld [vmem:[#allocation6 + $0x28] sm:$0xff]  }
  0x62   : > { %v1140_v38 = vld [vmem:[#allocation6 + $0x20] sm:$0xff]   ;;  %v1142_v50 = vld [vmem:[#allocation6 + $0x30] sm:$0xff]   ;;  %v1143_v51 = vld [vmem:[#allocation6 + $0x38] sm:$0xff]  }
  0x63   : > { %1006 = vmatpush3.bf16.msra.mxu0 %v1118_v4  ;;  %1018 = vmatpush3.bf16.msra.mxu1 %v1122_v9  ;;  %v931_v40 = vld [vmem:[%s1511_s4] ss:$0 sm:$0xff] }
  0x64   : > { %1007 = vmatprep.subr.bf16.mxu0 %v1249_v0  ;;  %1019 = vmatprep.subr.bf16.mxu1 %v1249_v0  ;;  %v940_v52 = vld [vmem:[%s1513_s6] ss:$0 sm:$0xff] }
  0x65   : > { %v949_v62 = vld [vmem:[%s1515_s8] ss:$0 sm:$0xff] }
  0x67   : > { %1008 = vmatpush3.bf16.msra.mxu0 %v1119_v6  ;;  %1020 = vmatpush3.bf16.msra.mxu1 %v1123_v11 }
  0x68   : > { %1033 = vmatprep.subr.bf16.mxu0 %v1249_v0  ;;  %1021 = vmatprep.subr.bf16.mxu1 %v1249_v0 }
  0x6a   : > { %1010 = vmatmul.mubr.msk.bf16.vlgmr.msra.gmra.mrb[0].mxu0 %vm423_vm1, %v383_v10 }
  0x6b   : > { %1049 = vmatprep.mubr.msk.bf16.mxu0 %vm1250_vm0, %v1249_v0  ;;  %1022 = vmatpush3.bf16.msra.mxu1 %v1124_v12 }
  0x6c   : > { %1023 = vmatprep.subr.bf16.mxu1 %v1249_v0  ;;  %1034 = vmatpush3.bf16.msra.mxu0 %v1128_v16 }
  0x6d   : > { %1035 = vmatprep.subr.bf16.mxu0 %v1249_v0 }
  0x6f   : > { %1024 = vmatpush3.bf16.msra.mxu1 %v1125_v13 }
  0x70   : > { %1025 = vmatprep.subr.bf16.mxu1 %v1249_v0  ;;  %1036 = vmatpush3.bf16.msra.mxu0 %v1129_v17 }
  0x71   : > { %1037 = vmatprep.subr.bf16.mxu0 %v1249_v0 }
  0x73   : > { %1026 = vmatpush3.bf16.msra.mxu1 %v1126_v14 }
  0x74   : > { %1027 = vmatprep.subr.bf16.mxu1 %v1249_v0  ;;  %1038 = vmatpush3.bf16.msra.mxu0 %v1130_v18 }
  0x75   : > { %1039 = vmatprep.subr.bf16.mxu0 %v1249_v0 }
  0x77   : > { %1028 = vmatpush3.bf16.msra.mxu1 %v1127_v15 }
  0x78   : > { %1053 = vmatprep.subr.bf16.mxu1 %v1249_v0  ;;  %1040 = vmatpush3.bf16.msra.mxu0 %v1131_v19 }
  0x79   : > { %1041 = vmatprep.subr.bf16.mxu0 %v1249_v0 }
  0x7c   : > { %1042 = vmatpush3.bf16.msra.mxu0 %v1132_v20 }
  0x7d   : > { %1043 = vmatprep.subr.bf16.mxu0 %v1249_v0 }
  0x80   : > { %1044 = vmatpush3.bf16.msra.mxu0 %v1133_v21 }
  0x81   : > { %1045 = vmatprep.subr.bf16.mxu0 %v1249_v0 }
  0x84   : > { %1046 = vmatpush3.bf16.msra.mxu0 %v1134_v32 }
  0x85   : > { %1047 = vmatprep.subr.bf16.mxu0 %v1249_v0 }
  0x88   : > { %1048 = vmatpush3.bf16.msra.mxu0 %v1135_v33 }
 0x13d   : > { %v461_v23 = vpop.f32.mrb[0].mxu0 }
 0x13e   : > { %v462_v24 = vadd.f32 %v925_v22, %v461_v23  ;;  %v1011_v25 = vpop.f32.mrb[1].mxu0 }
 0x13f   : > { %v464_v26 = vpop.f32.mrb[2].mxu0 }
 0x140   : > { %v465_v27 = vadd.f32 %v925_v22, %v464_v26  ;;  %v1012_v28 = vpop.f32.mrb[3].mxu0  ;;  %v468_v29 = vmax.f32 %v462_v24, 0.0 }
 0x142   : > { %v469_v30 = vmax.f32 %v465_v27, 0.0 }
 0x144   : > { %v470_v31 = vpack.c.bf16 %v469_v30, %v468_v29 }
 0x146   : > { %1030 = vmatmul.mubr.bf16.vlgmr.msra.gmra.mrb[0].mxu1 %v470_v31 }
 0x147   : > { %1069 = vmatprep.mubr.msk.bf16.mxu1 %vm1250_vm0, %v1249_v0  ;;  %1054 = vmatpush3.bf16.msra.mxu1 %v1136_v34 }
 0x148   : > { %1055 = vmatprep.subr.bf16.mxu1 %v1249_v0 }
 0x14b   : > { %1056 = vmatpush3.bf16.msra.mxu1 %v1137_v35 }
 0x14c   : > { %1057 = vmatprep.subr.bf16.mxu1 %v1249_v0 }
 0x14f   : > { %1058 = vmatpush3.bf16.msra.mxu1 %v1138_v36 }
 0x150   : > { %1059 = vmatprep.subr.bf16.mxu1 %v1249_v0 }
 0x153   : > { %1060 = vmatpush3.bf16.msra.mxu1 %v1139_v37 }
 0x154   : > { %1061 = vmatprep.subr.bf16.mxu1 %v1249_v0 }
 0x157   : > { %1062 = vmatpush3.bf16.msra.mxu1 %v1140_v38 }
 0x158   : > { %1063 = vmatprep.subr.bf16.mxu1 %v1249_v0 }
 0x15b   : > { %1064 = vmatpush3.bf16.msra.mxu1 %v1141_v39 }
 0x15c   : > { %1065 = vmatprep.subr.bf16.mxu1 %v1249_v0 }
 0x15f   : > { %1066 = vmatpush3.bf16.msra.mxu1 %v1142_v50 }
 0x160   : > { %1067 = vmatprep.subr.bf16.mxu1 %v1249_v0 }
 0x163   : > { %1068 = vmatpush3.bf16.msra.mxu1 %v1143_v51 }
 0x219   : > { %v576_v41 = vpop.f32.mrb[0].mxu1 }
 0x21a   : > { %v577_v42 = vadd.f32 %v931_v40, %v576_v41  ;;  %v1031_v43 = vpop.f32.mrb[1].mxu1 }
 0x21b   : > { %v579_v44 = vpop.f32.mrb[2].mxu1 }
 0x21c   : > { %v580_v45 = vadd.f32 %v931_v40, %v579_v44  ;;  %v1032_v46 = vpop.f32.mrb[3].mxu1  ;;  %v583_v47 = vmax.f32 %v577_v42, 0.0 }
 0x21e   : > { %v584_v48 = vmax.f32 %v580_v45, 0.0 }
 0x220   : > { %v585_v49 = vpack.c.bf16 %v584_v48, %v583_v47 }
 0x222   : > { %1050 = vmatmul.mubr.bf16.vlgmr.msra.gmra.mrb[4].mxu0 %v585_v49 }
 0x2f5   : > { %v691_v53 = vpop.f32.mrb[4].mxu0 }
 0x2f6   : > { %v692_v54 = vadd.f32 %v940_v52, %v691_v53  ;;  %v1051_v55 = vpop.f32.mrb[5].mxu0 }
 0x2f7   : > { %v694_v56 = vpop.f32.mrb[6].mxu0 }
 0x2f8   : > { %v695_v57 = vadd.f32 %v940_v52, %v694_v56  ;;  %v1052_v58 = vpop.f32.mrb[7].mxu0  ;;  %v698_v59 = vmax.f32 %v692_v54, 0.0 }
 0x2fa   : > { %v699_v60 = vmax.f32 %v695_v57, 0.0 }
 0x2fc   : > { %v700_v61 = vpack.c.bf16 %v699_v60, %v698_v59 }
 0x2fe   : > { %1070 = vmatmul.mubr.bf16.vlgmr.msra.gmra.mrb[4].mxu1 %v700_v61 }
 0x3d1   : > { %v806_v63 = vpop.f32.mrb[4].mxu1 }
 0x3d2   : > { %v1071_v0 = vpop.f32.mrb[5].mxu1  ;;  %v807_v2 = vadd.f32 %v949_v62, %v806_v63 }
 0x3d3   : > { %v809_v1 = vpop.f32.mrb[6].mxu1 }
 0x3d4   : > { %v810_v3 = vadd.f32 %v949_v62, %v809_v1  ;;  %v1072_v4 = vpop.f32.mrb[7].mxu1 }
 0x3d6   : > { %v967_v5 = vpack.c.bf16 %v810_v3, %v807_v2 }
 0x3d8   : > { %968 = vst [vmem:[%s378_s22] sm:$0xff] %v967_v5  }
 0x3d9 PF: > { %s21_s30 = sadd.s32 1, %s1242_s30  }
 0x3da   : > { %p18_p3 = scmp.ge.s32.totalorder %s21_s30, 4  }
 0x3dc   :  { %20 = sbr.rel (!%p18_p3) target bundleno = 2 (0x2), region = 99 }
 0x3e3   :  { %845 = vsyncpa [#allocation3], 1 }
 0x3e4   :  { %847 = vsyncpa [#allocation3 + $0x1], 1 }
 0x3e5   :  { %848 = vsyncpa [#allocation5], 1 }

</bundles_post_ra>
